<compile_context>
chip_gen: v7x
topology: tpu7x:2x2x1
jax: 0.10.0
libtpu: 0.0.40
codegen_flags: <defaults>
</compile_context>

<pallas_src>
import math

import jax
import jax.numpy as jnp
import numpy as np
from jax.experimental import pallas as pl
from jax.experimental.pallas import tpu as pltpu


# ---------------------------------------------------------------------------
# Host-side constant: exact transcription of the torch module's sinusoid().
# ---------------------------------------------------------------------------
def sinusoid_table(max_seq, embedding_dim):
    tbl = np.array(
        [[math.sin(pos * math.exp(-math.log(10000) * i / embedding_dim)
                   * math.exp(math.log(10000) / embedding_dim * (i % 2))
                   + 0.5 * math.pi * (i % 2))
          for i in range(embedding_dim)]
         for pos in range(max_seq)],
        dtype=np.float32,
    )
    return tbl  # (max_seq, embedding_dim)


# ---------------------------------------------------------------------------
# Pallas kernel: out = x + pos_emb  (pos_emb broadcast over the batch axis)
# ---------------------------------------------------------------------------
def _add_pos_kernel(x_ref, pe_ref, o_ref):
    # x_ref: (b_block, c_block), pe_ref: (1, c_block) -> VPU broadcast add.
    o_ref[...] = x_ref[...] + pe_ref[...]


def dynamic_position_embedding(x, pos_table, *, b_block=None, c_block=None):
    """x: (B, L, D) array; pos_table: (max_seq, D) sinusoid table (max_seq >= L)."""
    B, L, D = x.shape
    assert pos_table.shape[0] >= L and pos_table.shape[1] == D

    total = L * D
    dtype_size = jnp.dtype(x.dtype).itemsize

    # Slice the table to the current sequence length (indexing only, no FLOPs),
    # exactly like `positional_embedding[:, :x.size(1), :]` in torch, then
    # flatten (L, D) -> (1, L*D) so the lane axis is L*D-wide.
    pe = jnp.asarray(pos_table[:L, :], dtype=x.dtype).reshape(1, total)
    x2 = x.reshape(B, total)

    # ---- column (lane) tile: multiple of 128, or the full L*D extent --------
    if c_block is None:
        max_c = 16384  # 64 KiB (f32) per batch row per tile
        if total <= max_c or total % 128 != 0:
            c_block = total
        else:
            c_block = total
            cand = (max_c // 128) * 128
            while cand >= 128:
                if total % cand == 0:
                    c_block = cand
                    break
                cand -= 128
    if c_block > total or total % c_block != 0 or (c_block != total and c_block % 128 != 0):
        c_block = total

    # ---- batch (sublane) tile: pack rows up to ~2 MiB per tile --------------
    if b_block is None:
        target_bytes = 2 * 1024 * 1024
        if B % 8 != 0:
            b_block = B
        else:
            b_block = 8
            while (B % (b_block * 2) == 0
                   and (b_block * 2) * c_block * dtype_size <= target_bytes):
                b_block *= 2
    if b_block > B or B % b_block != 0 or (b_block != B and b_block % 8 != 0):
        b_block = B

    grid = (B // b_block, total // c_block)

    x_spec = pl.BlockSpec((b_block, c_block), lambda i, j: (i, j))
    pe_spec = pl.BlockSpec((1, c_block), lambda i, j: (0, j))

    out = pl.pallas_call(
        _add_pos_kernel,
        out_shape=jax.ShapeDtypeStruct((B, total), x.dtype),
        grid_spec=pltpu.PrefetchScalarGridSpec(
            num_scalar_prefetch=0,
            grid=grid,
            in_specs=[x_spec, pe_spec],
            out_specs=x_spec,
        ),
        compiler_params=pltpu.CompilerParams(
            dimension_semantics=("parallel", "parallel"),
        ),
    )(x2, pe)

    return out.reshape(B, L, D)


# ---------------------------------------------------------------------------
# Pure-JAX reference (same formula / broadcast as the torch forward).
# ---------------------------------------------------------------------------
def reference(x, pos_table):
    L = x.shape[1]
    return x + jnp.asarray(pos_table, dtype=x.dtype)[None, :L, :]


if __name__ == "__main__":
    B, L, D = 2, 8, 32
    MAX_SEQ = 32  # module default is 2048; kept small for the demo

    pos_table = sinusoid_table(MAX_SEQ, D)

    key = jax.random.PRNGKey(0)
    x = jax.random.normal(key, (B, L, D), jnp.float32)

    out = dynamic_position_embedding(x, pos_table)
    out = jax.block_until_ready(out)

    ref = reference(x, pos_table)
    assert out.shape == (B, L, D)
    np.testing.assert_allclose(np.asarray(out), np.asarray(ref), rtol=1e-6, atol=1e-6)
    print("KERNEL_OK")
</pallas_src>

<mosaic_0001>
module attributes {stable_mosaic.version = 11 : i64} {
  func.func @_add_pos_kernel(%arg0: i32, %arg1: i32, %arg2: memref<2x256xf32, #tpu.memory_space<vmem>>, %arg3: memref<1x256xf32, #tpu.memory_space<vmem>>, %arg4: memref<2x256xf32, #tpu.memory_space<vmem>>) attributes {dimension_semantics = [#tpu.dimension_semantics<parallel>, #tpu.dimension_semantics<parallel>], iteration_bounds = array<i64: 1, 1>, scalar_prefetch = 0 : i64, scratch_operands = 0 : i64, tpu.core_type = #tpu.core_type<tc>, window_params = [{transform_indices = @transform_0, window_bounds = array<i64: 2, 256>}, {transform_indices = @transform_1, window_bounds = array<i64: 1, 256>}, {transform_indices = @transform_2, window_bounds = array<i64: 2, 256>}]} {
    %c0 = arith.constant 0 : index
    %c0_0 = arith.constant 0 : index
    %0 = vector.load %arg2[%c0, %c0_0] : memref<2x256xf32, #tpu.memory_space<vmem>>, vector<2x256xf32>
    %c0_1 = arith.constant 0 : index
    %c0_2 = arith.constant 0 : index
    %1 = vector.load %arg3[%c0_1, %c0_2] : memref<1x256xf32, #tpu.memory_space<vmem>>, vector<1x256xf32>
    %2 = vector.broadcast %1 : vector<1x256xf32> to vector<2x256xf32>
    %3 = arith.addf %0, %2 : vector<2x256xf32>
    %c0_3 = arith.constant 0 : index
    %c0_4 = arith.constant 0 : index
    %4 = vector.load %arg4[%c0_3, %c0_4] : memref<2x256xf32, #tpu.memory_space<vmem>>, vector<2x256xf32>
    tpu.vector_store %arg4[%c0_3, %c0_4], %3 {strides = array<i32>} : memref<2x256xf32, #tpu.memory_space<vmem>>, vector<2x256xf32>,
    return
  }
  func.func @transform_0(%arg0: i32, %arg1: i32) -> (i32, i32) {
    %c0_i32 = arith.constant 0 : i32
    return %arg0, %arg1 : i32, i32
  }
  func.func @transform_1(%arg0: i32, %arg1: i32) -> (i32, i32) {
    %c0_i32 = arith.constant 0 : i32
    %c0_i32_0 = arith.constant 0 : i32
    return %c0_i32, %arg1 : i32, i32
  }
  func.func @transform_2(%arg0: i32, %arg1: i32) -> (i32, i32) {
    %c0_i32 = arith.constant 0 : i32
    return %arg0, %arg1 : i32, i32
  }
}

</mosaic_0001>

<bundles_post_ra>
// kernel: tpu_custom_call.1
= control target key start
LH: loop header
LB: loop body
LE: loop exit
PB: predicated region body
PF: predicated region fallthrough
CT: control target
= control target key end

     0   :  { %7 = vsyncpa [#allocation3], 0  ;;  %s157_s0 = inlined_call_operand.hbm [shape: f32[2,256], index: 0, kind: input, shape index: {}]   ;;  %s158_s1 = inlined_call_operand.vmem [shape: f32[1,256], index: 1, kind: input, shape index: {}]   ;;  %s159_s2 = inlined_call_operand.hbm [shape: f32[2,256], index: 2, kind: output, shape index: {}]  }
   0x1   :  { %8 = vsyncpa [#allocation4], 0  ;;  %s112_s9 = smov [#allocation2]   ;;  %s64_s13 = scalar_lea.hbm %s157_s0, 64 }
   0x2   :  { %s15_s10 = sshll.u32 %s112_s9, 4  ;;  %p65_p0 = scmp.ne.s32.totalorder %s157_s0, %s64_s13  ;;  %s16_s10 = int_to_ptr.vmem [resolvable:$true] %s15_s10 }
   0x3   :  { %p68_p1 = scmp.lt.u32.totalorder %s64_s13, %s157_s0 }
   0x5   :  { %p70_p2 = pnand %p68_p1, %p65_p0 }
   0x7   :  { %73 = shalt.err (!%p70_p2)
}
   0x8   :  { %s74_s18 = scalar_lea.vmem %s16_s10, 64  ;;  %p79_p4 = scmp.lt.s32.totalorder %s16_s10, %s16_s10 }
   0x9   :  { %p75_p3 = scmp.ne.s32.totalorder %s16_s10, %s74_s18  ;;  %p80_p5 = scmp.lt.s32.totalorder %s74_s18, %s74_s18 }
   0xb   :  { %p81_p6 = por %p80_p5, %p79_p4 }
   0xd   :  { %p82_p7 = pnand %p81_p6, %p75_p3 }
   0xf   :  { %85 = shalt.err (!%p82_p7)
}
  0x10   :  { %18 = dma.hbm_to_vmem [thread:$0]  %s157_s0, 64, %s16_s10, [#allocation3]  }
  0x11   :  { %108 = dma.done.wait [#allocation3], 64  }
  0x12   :  { %109 = vsyncadd [#allocation3], 4294967232  ;;  %v27_v0 = vlaneseq  ;;  %v113_v1 = vmov 1983009808   ;;  %v25_v7 = vld [vmem:[%s158_s1] sm:$0x3] }
  0x13   :  { %v37_v2 = vunpack.c.l.s4 %v113_v1  ;;  %v24_v12 = vld [vmem:[#allocation2] sm:$0xf]  ;;  %s114_s23 = smov [#allocation5]  }
  0x14   :  { %v28_v3 = vshrl.u32 %v27_v0, 7  ;;  %s52_s0 = sshll.u32 %s114_s23, 4  ;;  %s53_s0 = int_to_ptr.vmem [resolvable:$true] %s52_s0 }
  0x15   :  { %v38_v6 = vunpack.c.0.s8 %v37_v2  ;;  %s86_s24 = scalar_lea.vmem %s53_s0, 64  ;;  %p91_p9 = scmp.lt.s32.totalorder %s53_s0, %s53_s0 }
  0x16   :  { %v29_v4 = vsub.s32 0, %v28_v3  ;;  %v33_v5 = vsub.s32 1, %v28_v3  ;;  %p87_p8 = scmp.ne.s32.totalorder %s53_s0, %s86_s24  ;;  %p92_p10 = scmp.lt.s32.totalorder %s86_s24, %s86_s24 }
  0x17   :  { %v41_v10 = vsub.s32 %v38_v6, %v28_v3 }
  0x18   :  { %v30_v8 = vrot.slane %v25_v7, %v29_v4  ;;  %v34_v9 = vrot.slane %v25_v7, %v33_v5  ;;  %p93_p11 = por %p92_p10, %p91_p9 }
  0x1a   :  { %v35_v11 = vcombine.low %v30_v8, %v34_v9  ;;  %p94_p12 = pnand %p93_p11, %p87_p8 }
  0x1c   :  { %v42_v13 = vrot.slane %v35_v11, %v41_v10 }
  0x1e   :  { %v44_v14 = vadd.f32 %v42_v13, %v24_v12 }
  0x20   :  { %45 = vst [vmem:[#allocation5] sm:$0xf] %v44_v14 }
  0x21   :  { %97 = shalt.err (!%p94_p12)
}
  0x22   :  { %s98_s26 = scalar_lea.hbm %s159_s2, 64 }
  0x23   :  { %p99_p13 = scmp.ne.s32.totalorder %s159_s2, %s98_s26  ;;  %p102_p0 = scmp.lt.u32.totalorder %s98_s26, %s159_s2 }
  0x25   :  { %p104_p1 = pnand %p102_p0, %p99_p13 }
  0x27   :  { %107 = shalt.err (!%p104_p1)
}
  0x28   :  { %55 = dma.vmem_to_hbm [thread:$0]  %s53_s0, 64, %s159_s2, [#allocation4]  }
  0x29   :  { %110 = dma.done.wait [#allocation4], 64  }
  0x2a   :  { %111 = vsyncadd [#allocation4], 4294967232 }
  0x2b   :  { %59 = vsyncpa [#allocation3], 1 }
  0x2c   :  { %60 = vsyncpa [#allocation4], 1 }

</bundles_post_ra>
